<compile_context>
chip_gen: v6e
topology: v6e:2x2x1
jax: 0.10.0
libtpu: 0.0.40
codegen_flags: <defaults>
</compile_context>

<pallas_src>
import functools

import jax
import jax.numpy as jnp
from jax.experimental import pallas as pl
from jax.experimental.pallas import tpu as pltpu


def _mlp_kernel(xT_ref, w1_ref, b1_ref, w2_ref, b2_ref, w3_ref, b3_ref, oT_ref):
    # Layer 1: (64, F) @ (F, TB) + (64, 1) -> ReLU        (batch on lanes)
    h1 = jnp.dot(w1_ref[...], xT_ref[...], preferred_element_type=jnp.float32)
    h1 = jnp.maximum(h1 + b1_ref[...], 0.0)
    # Layer 2: (32, 64) @ (64, TB) + (32, 1) -> ReLU
    h2 = jnp.dot(w2_ref[...], h1, preferred_element_type=jnp.float32)
    h2 = jnp.maximum(h2 + b2_ref[...], 0.0)
    # Layer 3: (2, 32) @ (32, TB) + (2, 1)   -> lane-dense (2, TB) store
    out = jnp.dot(w3_ref[...], h2, preferred_element_type=jnp.float32)
    oT_ref[...] = (out + b3_ref[...]).astype(oT_ref.dtype)


def mynn_forward(x, params, *, max_batch_tile=1024):
    """Run the MyNN forward pass as a Pallas TPU kernel.

    x: (B, num_features) float32
    params: dict with w1 (64,F), b1 (64,1), w2 (32,64), b2 (32,1), w3 (2,32), b3 (2,1)
            (PyTorch (out, in) layout)
    returns: (B, 2) float32
    """
    w1, b1 = params["w1"], params["b1"]
    w2, b2 = params["w2"], params["b2"]
    w3, b3 = params["w3"], params["b3"]

    B, F = x.shape
    H1, H2, O = w1.shape[0], w2.shape[0], w3.shape[0]

    # Batch-on-lanes: feed the kernel x^T (F, B). Wrapper-side transposes are
    # cheap layout plumbing handled by XLA outside the kernel.
    xT = x.T

    if B <= max_batch_tile:
        TB = B                      # single block == full array (exempt from 8x128 rule)
        Bp = B
    else:
        TB = max_batch_tile         # multiple of 128
        Bp = pl.cdiv(B, TB) * TB
        if Bp != B:
            xT = jnp.pad(xT, ((0, 0), (0, Bp - B)))

    grid = (Bp // TB,)

    # x^T / out^T are tiled over the batch (lane) axis; weights/biases stay
    # resident in VMEM across grid steps (index_map always returns block 0).
    x_spec = pl.BlockSpec((F, TB), lambda i: (0, i))
    out_spec = pl.BlockSpec((O, TB), lambda i: (0, i))
    w_specs = [
        pl.BlockSpec((H1, F), lambda i: (0, 0)),
        pl.BlockSpec((H1, 1), lambda i: (0, 0)),
        pl.BlockSpec((H2, H1), lambda i: (0, 0)),
        pl.BlockSpec((H2, 1), lambda i: (0, 0)),
        pl.BlockSpec((O, H2), lambda i: (0, 0)),
        pl.BlockSpec((O, 1), lambda i: (0, 0)),
    ]

    flops = 2 * B * (F * H1 + H1 * H2 + H2 * O)
    bytes_accessed = 4 * (
        B * F + B * O + H1 * F + H1 + H2 * H1 + H2 + O * H2 + O
    )

    outT = pl.pallas_call(
        _mlp_kernel,
        out_shape=jax.ShapeDtypeStruct((O, Bp), jnp.float32),
        grid=grid,
        in_specs=[x_spec] + w_specs,
        out_specs=out_spec,
        compiler_params=pltpu.CompilerParams(
            dimension_semantics=("parallel",),
            vmem_limit_bytes=32 * 1024 * 1024,
        ),
        cost_estimate=pl.CostEstimate(
            flops=flops, transcendentals=0, bytes_accessed=bytes_accessed
        ),
    )(xT, w1, b1, w2, b2, w3, b3)

    return outT[:, :B].T


def init_params(key, num_features):
    """Deterministic PyTorch-style (uniform) init; weights stored (out, in)."""
    ks = jax.random.split(key, 6)

    def linear_init(kw, kb, fan_in, fan_out):
        bound = 1.0 / jnp.sqrt(fan_in)
        w = jax.random.uniform(kw, (fan_out, fan_in), jnp.float32, -bound, bound)
        b = jax.random.uniform(kb, (fan_out, 1), jnp.float32, -bound, bound)
        return w, b

    w1, b1 = linear_init(ks[0], ks[1], num_features, 64)
    w2, b2 = linear_init(ks[2], ks[3], 64, 32)
    w3, b3 = linear_init(ks[4], ks[5], 32, 2)
    return {"w1": w1, "b1": b1, "w2": w2, "b2": b2, "w3": w3, "b3": b3}


def mynn_reference(x, p):
    """Pure-JAX reference (matches PyTorch nn.Linear: y = x @ W.T + b)."""
    h1 = jnp.maximum(x @ p["w1"].T + p["b1"].T, 0.0)
    h2 = jnp.maximum(h1 @ p["w2"].T + p["b2"].T, 0.0)
    return h2 @ p["w3"].T + p["b3"].T


if __name__ == "__main__":
    key = jax.random.PRNGKey(0)
    k_param, k_x1, k_x2 = jax.random.split(key, 3)

    num_features = 4  # CartPole observation dim
    params = init_params(k_param, num_features)

    # Small CartPole-scale batch.
    batch = 8
    x = jax.random.normal(k_x1, (batch, num_features), jnp.float32)
    out = jax.block_until_ready(mynn_forward(x, params))
    ref = mynn_reference(x, params)
    assert out.shape == (batch, 2)
    assert jnp.allclose(out, ref, atol=1e-5, rtol=1e-5), "mismatch vs reference (B=8)"

    # A larger (still modest) batch to exercise the lane-dense gridded path
    # with B not a multiple of 128 (block == full array, so still legal).
    batch2 = 300
    x2 = jax.random.normal(k_x2, (batch2, num_features), jnp.float32)
    out2 = jax.block_until_ready(mynn_forward(x2, params))
    ref2 = mynn_reference(x2, params)
    assert out2.shape == (batch2, 2)
    assert jnp.allclose(out2, ref2, atol=1e-5, rtol=1e-5), "mismatch vs reference (B=300)"

    print("KERNEL_OK")
</pallas_src>

<mosaic_0001>
module attributes {stable_mosaic.version = 11 : i64} {
  func.func @_mlp_kernel(%arg0: i32, %arg1: memref<4x8xf32, #tpu.memory_space<vmem>>, %arg2: memref<64x4xf32, #tpu.memory_space<vmem>>, %arg3: memref<64x1xf32, #tpu.memory_space<vmem>>, %arg4: memref<32x64xf32, #tpu.memory_space<vmem>>, %arg5: memref<32x1xf32, #tpu.memory_space<vmem>>, %arg6: memref<2x32xf32, #tpu.memory_space<vmem>>, %arg7: memref<2x1xf32, #tpu.memory_space<vmem>>, %arg8: memref<2x8xf32, #tpu.memory_space<vmem>>) attributes {dimension_semantics = [#tpu.dimension_semantics<parallel>], iteration_bounds = array<i64: 1>, scalar_prefetch = 0 : i64, scratch_operands = 0 : i64, tpu.core_type = #tpu.core_type<tc>, window_params = [{transform_indices = @transform_0, window_bounds = array<i64: 4, 8>}, {pipeline_mode = #tpu.pipeline_mode<synchronous>, transform_indices = @transform_1, window_bounds = array<i64: 64, 4>}, {pipeline_mode = #tpu.pipeline_mode<synchronous>, transform_indices = @transform_2, window_bounds = array<i64: 64, 1>}, {pipeline_mode = #tpu.pipeline_mode<synchronous>, transform_indices = @transform_3, window_bounds = array<i64: 32, 64>}, {pipeline_mode = #tpu.pipeline_mode<synchronous>, transform_indices = @transform_4, window_bounds = array<i64: 32, 1>}, {pipeline_mode = #tpu.pipeline_mode<synchronous>, transform_indices = @transform_5, window_bounds = array<i64: 2, 32>}, {pipeline_mode = #tpu.pipeline_mode<synchronous>, transform_indices = @transform_6, window_bounds = array<i64: 2, 1>}, {transform_indices = @transform_7, window_bounds = array<i64: 2, 8>}]} {
    %c0 = arith.constant 0 : index
    %c0_0 = arith.constant 0 : index
    %0 = vector.load %arg2[%c0, %c0_0] : memref<64x4xf32, #tpu.memory_space<vmem>>, vector<64x4xf32>
    %c0_1 = arith.constant 0 : index
    %c0_2 = arith.constant 0 : index
    %1 = vector.load %arg1[%c0_1, %c0_2] : memref<4x8xf32, #tpu.memory_space<vmem>>, vector<4x8xf32>
    %cst = arith.constant dense<0.000000e+00> : vector<64x8xf32>
    %2 = tpu.matmul %0, %1, %cst {dimension_numbers = #tpu.dot_dimension_numbers<[1], [0], [0], [1], [0, 0, 1, 1], [], []>} : vector<64x4xf32>, vector<4x8xf32>, vector<64x8xf32> -> vector<64x8xf32>
    %c0_3 = arith.constant 0 : index
    %c0_4 = arith.constant 0 : index
    %3 = vector.load %arg3[%c0_3, %c0_4] : memref<64x1xf32, #tpu.memory_space<vmem>>, vector<64x1xf32>
    %4 = vector.broadcast %3 : vector<64x1xf32> to vector<64x8xf32>
    %5 = arith.addf %2, %4 : vector<64x8xf32>
    %cst_5 = arith.constant 0.000000e+00 : f32
    %6 = vector.broadcast %cst_5 : f32 to vector<64x8xf32>
    %7 = arith.maximumf %5, %6 : vector<64x8xf32>
    %c0_6 = arith.constant 0 : index
    %c0_7 = arith.constant 0 : index
    %8 = vector.load %arg4[%c0_6, %c0_7] : memref<32x64xf32, #tpu.memory_space<vmem>>, vector<32x64xf32>
    %cst_8 = arith.constant dense<0.000000e+00> : vector<32x8xf32>
    %9 = tpu.matmul %8, %7, %cst_8 {dimension_numbers = #tpu.dot_dimension_numbers<[1], [0], [0], [1], [0, 0, 1, 1], [], []>} : vector<32x64xf32>, vector<64x8xf32>, vector<32x8xf32> -> vector<32x8xf32>
    %c0_9 = arith.constant 0 : index
    %c0_10 = arith.constant 0 : index
    %10 = vector.load %arg5[%c0_9, %c0_10] : memref<32x1xf32, #tpu.memory_space<vmem>>, vector<32x1xf32>
    %11 = vector.broadcast %10 : vector<32x1xf32> to vector<32x8xf32>
    %12 = arith.addf %9, %11 : vector<32x8xf32>
    %cst_11 = arith.constant 0.000000e+00 : f32
    %13 = vector.broadcast %cst_11 : f32 to vector<32x8xf32>
    %14 = arith.maximumf %12, %13 : vector<32x8xf32>
    %c0_12 = arith.constant 0 : index
    %c0_13 = arith.constant 0 : index
    %15 = vector.load %arg6[%c0_12, %c0_13] : memref<2x32xf32, #tpu.memory_space<vmem>>, vector<2x32xf32>
    %cst_14 = arith.constant dense<0.000000e+00> : vector<2x8xf32>
    %16 = tpu.matmul %15, %14, %cst_14 {dimension_numbers = #tpu.dot_dimension_numbers<[1], [0], [0], [1], [0, 0, 1, 1], [], []>} : vector<2x32xf32>, vector<32x8xf32>, vector<2x8xf32> -> vector<2x8xf32>
    %c0_15 = arith.constant 0 : index
    %c0_16 = arith.constant 0 : index
    %17 = vector.load %arg7[%c0_15, %c0_16] : memref<2x1xf32, #tpu.memory_space<vmem>>, vector<2x1xf32>
    %18 = vector.broadcast %17 : vector<2x1xf32> to vector<2x8xf32>
    %19 = arith.addf %16, %18 : vector<2x8xf32>
    %c0_17 = arith.constant 0 : index
    %c0_18 = arith.constant 0 : index
    %20 = vector.load %arg8[%c0_17, %c0_18] : memref<2x8xf32, #tpu.memory_space<vmem>>, vector<2x8xf32>
    tpu.vector_store %arg8[%c0_17, %c0_18], %19 {strides = array<i32>} : memref<2x8xf32, #tpu.memory_space<vmem>>, vector<2x8xf32>,
    return
  }
  func.func @transform_0(%arg0: i32) -> (i32, i32) {
    %c0_i32 = arith.constant 0 : i32
    %c0_i32_0 = arith.constant 0 : i32
    return %c0_i32, %arg0 : i32, i32
  }
  func.func @transform_1(%arg0: i32) -> (i32, i32) {
    %c0_i32 = arith.constant 0 : i32
    %c0_i32_0 = arith.constant 0 : i32
    %c0_i32_1 = arith.constant 0 : i32
    return %c0_i32, %c0_i32_0 : i32, i32
  }
  func.func @transform_2(%arg0: i32) -> (i32, i32) {
    %c0_i32 = arith.constant 0 : i32
    %c0_i32_0 = arith.constant 0 : i32
    %c0_i32_1 = arith.constant 0 : i32
    return %c0_i32, %c0_i32_0 : i32, i32
  }
  func.func @transform_3(%arg0: i32) -> (i32, i32) {
    %c0_i32 = arith.constant 0 : i32
    %c0_i32_0 = arith.constant 0 : i32
    %c0_i32_1 = arith.constant 0 : i32
    return %c0_i32, %c0_i32_0 : i32, i32
  }
  func.func @transform_4(%arg0: i32) -> (i32, i32) {
    %c0_i32 = arith.constant 0 : i32
    %c0_i32_0 = arith.constant 0 : i32
    %c0_i32_1 = arith.constant 0 : i32
    return %c0_i32, %c0_i32_0 : i32, i32
  }
  func.func @transform_5(%arg0: i32) -> (i32, i32) {
    %c0_i32 = arith.constant 0 : i32
    %c0_i32_0 = arith.constant 0 : i32
    %c0_i32_1 = arith.constant 0 : i32
    return %c0_i32, %c0_i32_0 : i32, i32
  }
  func.func @transform_6(%arg0: i32) -> (i32, i32) {
    %c0_i32 = arith.constant 0 : i32
    %c0_i32_0 = arith.constant 0 : i32
    %c0_i32_1 = arith.constant 0 : i32
    return %c0_i32, %c0_i32_0 : i32, i32
  }
  func.func @transform_7(%arg0: i32) -> (i32, i32) {
    %c0_i32 = arith.constant 0 : i32
    %c0_i32_0 = arith.constant 0 : i32
    return %c0_i32, %arg0 : i32, i32
  }
}

</mosaic_0001>

<bundles_post_ra>
// kernel: tpu_custom_call.1
= control target key start
LH: loop header
LB: loop body
LE: loop exit
PB: predicated region body
PF: predicated region fallthrough
CT: control target
= control target key end

     0   :  { %vm109_vm0 = vcmask 1043456   ;;  %vm84_vm1 = vcmask 31744   ;;  %v568_v4 = vmov 0   ;;  %s708_s0 = inlined_call_operand.vmem [shape: f32[4,8], index: 0, kind: input, shape index: {}]   ;;  %s709_s1 = inlined_call_operand.vmem [shape: f32[64,4], index: 1, kind: input, shape index: {}]   ;;  %s710_s2 = inlined_call_operand.vmem [shape: f32[64,1], index: 2, kind: input, shape index: {}]   ;;  %s711_s3 = inlined_call_operand.vmem [shape: f32[32,64], index: 3, kind: input, shape index: {}]   ;;  %s712_s4 = inlined_call_operand.vmem [shape: f32[32,1], index: 4, kind: input, shape index: {}]   ;;  %s713_s5 = inlined_call_operand.vmem [shape: f32[2,32], index: 5, kind: input, shape index: {}]   ;;  %s714_s6 = inlined_call_operand.vmem [shape: f32[2,1], index: 6, kind: input, shape index: {}]   ;;  %s715_s7 = inlined_call_operand.hbm [shape: f32[2,8], index: 7, kind: output, shape index: {}]  }
   0x1   :  { %v35_v0 = vld [vmem:[%s708_s0] sm:$0xf]  ;;  %v28_v2 = vld [vmem:[%s709_s1 + $0x8] sm:$0xff]  ;;  %v29_v3 = vld [vmem:[%s709_s1 + $0x10] sm:$0xff]  ;;  %544 = vset.pattern.permute.xlu0 %v568_v4  ;;  %545 = vset.pattern.permute.xlu1 %v568_v4 }
   0x2   :  { %v27_v1 = vld [vmem:[%s709_s1] sm:$0xff]  ;;  %493 = vmatprep.subr.msk.mxu0 %vm109_vm0, %v35_v0  ;;  %v43_v5 = vld [vmem:[%s710_s2 + $0x38] sm:$0xff]  ;;  %v41_v6 = vld [vmem:[%s710_s2 + $0x28] sm:$0xff] }
   0x3   :  { %495 = vmatprep.mubr.msk.f32.mxu0 %vm84_vm1, %v27_v1  ;;  %494 = vmatpush3.msk.msra.mxu0 %vm109_vm0, %v35_v0  ;;  %v30_v7 = vld [vmem:[%s709_s1 + $0x18] sm:$0xff]  ;;  %v31_v8 = vld [vmem:[%s709_s1 + $0x20] sm:$0xff]  ;;  %v42_v9 = vld [vmem:[%s710_s2 + $0x30] sm:$0xff] }
   0x4   :  { %496 = vmatmul.mubr.msk.f32.vlgmr.msra.gmra.mxu0 %vm84_vm1, %v28_v2  ;;  %81 = vperm.xlu0 %544, %v43_v5   ;;  %v40_v10 = vld [vmem:[%s710_s2 + $0x20] sm:$0xff] }
   0x5   :  { %498 = vmatprep.mubr.msk.f32.mxu0 %vm84_vm1, %v29_v3  ;;  %71 = vperm.xlu1 %545, %v41_v6  }
   0x8   :  { %499 = vmatmul.mubr.msk.f32.gmra.mxu0 %vm84_vm1, %v30_v7 }
   0x9   :  { %12 = vsyncpa [#allocation3], 0  ;;  %501 = vmatprep.mubr.msk.f32.mxu0 %vm84_vm1, %v31_v8  ;;  %v32_v11 = vld [vmem:[%s709_s1 + $0x28] sm:$0xff]  ;;  %76 = vperm.xlu0 %544, %v42_v9   ;;  %v33_v12 = vld [vmem:[%s709_s1 + $0x30] sm:$0xff]  ;;  %vm254_vm2 = vcmask 523264   ;;  %v569_v59 = vmov 0.0  }
   0xa   :  { %66 = vperm.xlu1 %545, %v40_v10   ;;  %v39_v13 = vld [vmem:[%s710_s2 + $0x18] sm:$0xff]  ;;  %v38_v14 = vld [vmem:[%s710_s2 + $0x10] sm:$0xff]  ;;  %v37_v16 = vld [vmem:[%s710_s2 + $0x8] sm:$0xff]  ;;  %529 = vmatprep.subr.mxu0 %v569_v59  ;;  %vm570_vm3 = vmmov 0   ;;  %vm363_vm4 = vcmask 261120   ;;  %s571_s25 = smov [#allocation2]  }
   0xb   :  { %v34_v15 = vld [vmem:[%s709_s1 + $0x38] sm:$0xff]  ;;  %v36_v17 = vld [vmem:[%s710_s2] sm:$0xff]  ;;  %v232_v19 = vld [vmem:[%s712_s4 + $0x10] sm:$0xff]  ;;  %s445_s26 = sshll.u32 %s571_s25, 4  ;;  %vm437_vm5 = vcmask 58368   ;;  %s446_s26 = int_to_ptr.vmem [resolvable:$true] %s445_s26 }
   0xc   :  { %502 = vmatmul.mubr.msk.f32.gmra.mxu0 %vm84_vm1, %v32_v11  ;;  %v233_v18 = vld [vmem:[%s712_s4 + $0x18] sm:$0xff]  ;;  %v231_v20 = vld [vmem:[%s712_s4 + $0x8] sm:$0xff]  ;;  %v230_v21 = vld [vmem:[%s712_s4] sm:$0xff]  ;;  %s546_s27 = scalar_lea.vmem %s446_s26, 32  ;;  %p551_p1 = scmp.lt.s32.totalorder %s446_s26, %s446_s26 }
   0xd   :  { %504 = vmatprep.mubr.msk.f32.mxu0 %vm84_vm1, %v33_v12  ;;  %61 = vperm.xlu0 %544, %v39_v13   ;;  %v357_v22 = vld [vmem:[%s714_s6] sm:$0x3]  ;;  %v227_v56 = vld [vmem:[%s711_s3 + $0x8] sm:$0xff]  ;;  %v228_v57 = vld [vmem:[%s711_s3 + $0x10] sm:$0xff]  ;;  %p547_p0 = scmp.ne.s32.totalorder %s446_s26, %s546_s27  ;;  %p552_p2 = scmp.lt.s32.totalorder %s546_s27, %s546_s27 }
   0xe   :  { %56 = vperm.xlu1 %545, %v38_v14   ;;  %v226_v23 = vld [vmem:[%s711_s3] sm:$0xff]  ;;  %v229_v58 = vld [vmem:[%s711_s3 + $0x18] sm:$0xff] }
   0xf   :  { %523 = vmatprep.mubr.msk.f32.mxu1 %vm254_vm2, %v226_v23  ;;  %v356_v12 = vld [vmem:[%s713_s5] sm:$0x3]  ;;  %p553_p3 = por %p552_p2, %p551_p1 }
  0x10   :  { %505 = vmatmul.mubr.msk.f32.gmra.mxu0 %vm84_vm1, %v34_v15 }
  0x11   :  { %51 = vperm.xlu0 %544, %v37_v16   ;;  %537 = vmatprep.mubr.msk.f32.mxu0 %vm570_vm3, %v569_v59  ;;  %p554_p4 = pnand %p553_p3, %p547_p0 }
  0x12   :  { %46 = vperm.xlu1 %545, %v36_v17  }
  0x15   :  { %251 = vperm.xlu0 %544, %v233_v18  }
  0x16   :  { %246 = vperm.xlu1 %545, %v232_v19  }
  0x19   :  { %241 = vperm.xlu0 %544, %v231_v20  }
  0x1a   :  { %236 = vperm.xlu1 %545, %v230_v21  }
  0x1d   :  { %360 = vperm.xlu0 %544, %v357_v22  }
  0x7f   :  { %v82_v26 = vpop.permute.xlu0 %81 }
  0x80   :  { %v72_v27 = vpop.permute.xlu1 %71 }
  0x84   :  { %v77_v31 = vpop.permute.xlu0 %76 }
  0x85   :  { %v67_v32 = vpop.permute.xlu1 %66 }
  0x88   :  { %v62_v40 = vpop.permute.xlu0 %61 }
  0x89   :  { %v57_v41 = vpop.permute.xlu1 %56 }
  0x8c   :  { %v52_v48 = vpop.permute.xlu0 %51 }
  0x8d   :  { %v47_v49 = vpop.permute.xlu1 %46 }
  0x90   :  { %v252_v60 = vpop.permute.xlu0 %251 }
  0x91   :  { %v247_v62 = vpop.permute.xlu1 %246 }
  0x94   :  { %v242_v2 = vpop.permute.xlu0 %241 }
  0x95   :  { %v237_v7 = vpop.permute.xlu1 %236 }
  0x98   :  { %v361_v13 = vpop.permute.xlu0 %360 }
  0xc4   :  { %v497_v24 = vpop.f32.mrf.mxu0 }
  0xc5   :  { %v185_v50 = vadd.f32 %v497_v24, %v52_v48 }
  0xc6   :  { %v179_v25 = vpop.f32.mrf.mxu0 }
  0xc7   :  { %v180_v52 = vadd.f32 %v179_v25, %v47_v49  ;;  %v219_v54 = vmax.f32 %v185_v50, 0.0 }
  0xc8   :  { %v500_v28 = vpop.f32.mrf.mxu0 }
  0xc9   :  { %v195_v44 = vadd.f32 %v500_v28, %v62_v40  ;;  %v218_v55 = vmax.f32 %v180_v52, 0.0 }
  0xca   :  { %v189_v29 = vpop.f32.mrf.mxu0 }
  0xcb   :  { %v190_v46 = vadd.f32 %v189_v29, %v57_v41  ;;  %v221_v51 = vmax.f32 %v195_v44, 0.0 }
  0xcc   :  { %v503_v30 = vpop.f32.mrf.mxu0 }
  0xcd   :  { %v205_v37 = vadd.f32 %v503_v30, %v72_v27  ;;  %v220_v53 = vmax.f32 %v190_v46, 0.0 }
  0xce   :  { %v199_v33 = vpop.f32.mrf.mxu0 }
  0xcf   :  { %v200_v42 = vadd.f32 %v199_v33, %v67_v32  ;;  %v223_v45 = vmax.f32 %v205_v37, 0.0 }
  0xd0   :  { %v506_v34 = vpop.f32.mrf.mxu0 }
  0xd1   :  { %v215_v35 = vadd.f32 %v506_v34, %v82_v26  ;;  %v222_v47 = vmax.f32 %v200_v42, 0.0 }
  0xd2   :  { %v209_v36 = vpop.f32.mrf.mxu0 }
  0xd3   :  { %v225_v38 = vmax.f32 %v215_v35, 0.0  ;;  %v210_v39 = vadd.f32 %v209_v36, %v77_v31 }
  0xd5   :  { %v224_v43 = vmax.f32 %v210_v39, 0.0  ;;  %507 = vmatprep.subr.mxu1 %v225_v38 }
  0xd6   :  { %508 = vmatpush3.msra.mxu1 %v225_v38 }
  0xd7   :  { %509 = vmatprep.subr.mxu1 %v224_v43 }
  0xd8   :  { %510 = vmatpush3.msra.mxu1 %v224_v43 }
  0xd9   :  { %511 = vmatprep.subr.mxu1 %v223_v45 }
  0xda   :  { %512 = vmatpush3.msra.mxu1 %v223_v45 }
  0xdb   :  { %513 = vmatprep.subr.mxu1 %v222_v47 }
  0xdc   :  { %514 = vmatpush3.msra.mxu1 %v222_v47 }
  0xdd   :  { %515 = vmatprep.subr.mxu1 %v221_v51 }
  0xde   :  { %516 = vmatpush3.msra.mxu1 %v221_v51 }
  0xdf   :  { %517 = vmatprep.subr.mxu1 %v220_v53 }
  0xe0   :  { %518 = vmatpush3.msra.mxu1 %v220_v53 }
  0xe1   :  { %519 = vmatprep.subr.mxu1 %v219_v54 }
  0xe2   :  { %520 = vmatpush3.msra.mxu1 %v219_v54 }
  0xe3   :  { %521 = vmatprep.subr.mxu1 %v218_v55 }
  0xe4   :  { %522 = vmatpush3.msra.mxu1 %v218_v55 }
  0xe5   :  { %524 = vmatmul.mubr.msk.f32.vlgmr.msra.gmra.mxu1 %vm254_vm2, %v227_v56 }
  0xe6   :  { %526 = vmatprep.mubr.msk.f32.mxu1 %vm254_vm2, %v228_v57 }
  0xe9   :  { %527 = vmatmul.mubr.msk.f32.gmra.mxu1 %vm254_vm2, %v229_v58 }
 0x1a5   :  { %v525_v61 = vpop.f32.mrf.mxu1 }
 0x1a6   :  { %v339_v4 = vadd.f32 %v525_v61, %v242_v2 }
 0x1a7   :  { %v333_v63 = vpop.f32.mrf.mxu1 }
 0x1a8   :  { %v334_v8 = vadd.f32 %v333_v63, %v237_v7  ;;  %v353_v10 = vmax.f32 %v339_v4, 0.0 }
 0x1a9   :  { %v528_v0 = vpop.f32.mrf.mxu1 }
 0x1aa   :  { %v349_v1 = vadd.f32 %v528_v0, %v252_v60  ;;  %v352_v11 = vmax.f32 %v334_v8, 0.0 }
 0x1ab   :  { %v343_v3 = vpop.f32.mrf.mxu1 }
 0x1ac   :  { %v355_v5 = vmax.f32 %v349_v1, 0.0  ;;  %v344_v6 = vadd.f32 %v343_v3, %v247_v62 }
 0x1ae   :  { %v354_v9 = vmax.f32 %v344_v6, 0.0  ;;  %530 = vmatpush3.msra.mxu0 %v355_v5 }
 0x1af   :  { %531 = vmatprep.subr.mxu0 %v569_v59 }
 0x1b0   :  { %532 = vmatpush3.msra.mxu0 %v354_v9 }
 0x1b1   :  { %533 = vmatprep.subr.mxu0 %v569_v59 }
 0x1b2   :  { %534 = vmatpush3.msra.mxu0 %v353_v10 }
 0x1b3   :  { %535 = vmatprep.subr.mxu0 %v569_v59 }
 0x1b4   :  { %536 = vmatpush3.msra.mxu0 %v352_v11 }
 0x1b5   :  { %538 = vmatmul.mubr.msk.f32.vlgmr.msra.gmra.mxu0 %vm363_vm4, %v356_v12 }
 0x275   :  { %v433_v14 = vpop.f32.mrf.mxu0 }
 0x276   :  { %v434_v15 = vadd.f32 %v433_v14, %v361_v13 }
 0x277   :  { %v539_v16 = vpop.f32.mrf.mxu0 }
 0x278   :  { %438 = vst.msk [vmem:[#allocation2] sm:$0x3] %vm437_vm5, %v434_v15 }
 0x279   :  { %557 = shalt.err (!%p554_p4)
}
 0x27a   :  { %448 = dma.vmem_to_hbm [thread:$0]  %s446_s26, 32, %s715_s7, [#allocation3]  }
 0x27b   :  { %566 = dma.done.wait [#allocation3], 32  }
 0x27c   :  { %567 = vsyncadd [#allocation3], 4294967264 }
 0x27d   :  { %452 = vsyncpa [#allocation3], 1 }

</bundles_post_ra>
